<compile_context>
chip_gen: v5e
topology: v5e:2x2
jax: 0.10.0
libtpu: 0.0.40
codegen_flags: <defaults>
</compile_context>

<pallas_src>
import functools

import jax
import jax.numpy as jnp
from jax.experimental import pallas as pl
from jax.experimental.pallas import tpu as pltpu

LANE = 128
SUBLANE = 8
VMEM_BUDGET = 48 * 1024 * 1024   # stay well under v7x's 64 MiB physical VMEM


def _round_up(n, m):
    return ((n + m - 1) // m) * m


def _fused_mlp_kernel(*refs, num_layers):
    """refs = (x_ref, w0, b0, w1, b1, ..., w_{L-1}, b_{L-1}, out_ref)."""
    x_ref = refs[0]
    o_ref = refs[-1]
    wb = refs[1:-1]

    h = x_ref[...]                                # (tb, in); ideally already bf16
    if h.dtype != jnp.bfloat16:                   # static (trace-time) branch
        h = h.astype(jnp.bfloat16)
    for i in range(num_layers):
        w = wb[2 * i][...]                        # (in, out) bf16
        b = wb[2 * i + 1][...]                    # (1, out)  f32
        y = jnp.dot(h, w, preferred_element_type=jnp.float32) + b
        if i < num_layers - 1:
            # ReLU in f32, then carry the activation in bf16: numerically
            # identical to casting at the next dot, half the live bytes.
            h = jnp.maximum(y, 0.0).astype(jnp.bfloat16)
        else:
            h = y                                 # final logits stay f32
    o_ref[...] = h.astype(o_ref.dtype)


def _choose_tile_b(batch):
    """Batch tile: minimal padding waste, prefer an even step count (v7x 2 TCs)."""
    b_sub = _round_up(batch, SUBLANE)
    if b_sub <= LANE:
        return b_sub                              # single small step, no waste
    best = None
    for tb in (256, 128):
        b_pad = _round_up(b_sub, tb)
        steps = b_pad // tb
        key = (b_pad - b_sub,                     # 1) fewest padded rows
               0 if steps % 2 == 0 else 1,        # 2) even grid steps (v7x)
               -tb)                               # 3) larger tile
        if best is None or key < best[0]:
            best = (key, tb)
    return best[1]


def _vmem_footprint_bytes(tb, in_dim, out_pad, x_itemsize, packed_params):
    resident = sum(int(w.size) * w.dtype.itemsize + int(b.size) * b.dtype.itemsize
                   for w, b in packed_params)     # single-buffered (Buffered(1))
    max_feat = max([in_dim] + [int(w.shape[1]) for w, _ in packed_params])
    tiles = (2 * tb * in_dim * x_itemsize         # x tile, double-buffered
             + 2 * tb * out_pad * 4)              # f32 out tile, double-buffered
    scratch = 4 * tb * max_feat * 4               # activation / temp headroom
    return resident + tiles + scratch


def fused_mlp_forward(x, packed_params):
    """Runs the whole MLP in one Pallas kernel. Returns (B, out_padded) f32."""
    B, in_dim = x.shape
    num_layers = len(packed_params)
    out_pad = packed_params[-1][0].shape[1]
    x_itemsize = jnp.dtype(x.dtype).itemsize

    tb = _choose_tile_b(B)
    # Clamp tile_b so the footprint fits the v7x-safe VMEM budget.
    while tb > SUBLANE and _vmem_footprint_bytes(
            tb, in_dim, out_pad, x_itemsize, packed_params) > VMEM_BUDGET:
        tb = max(SUBLANE, _round_up(tb // 2, SUBLANE))
    B_pad = _round_up(B, tb)
    if B_pad != B:
        x = jnp.pad(x, ((0, B_pad - B), (0, 0)))

    flat_inputs = [x]
    in_specs = [pl.BlockSpec((tb, in_dim), lambda i: (i, 0))]
    for w, b in packed_params:
        flat_inputs += [w, b]
        # Constant index_map -> fetched once and resident; Buffered(1) keeps a
        # single VMEM copy instead of the default double buffer.
        in_specs += [
            pl.BlockSpec(w.shape, lambda i: (0, 0), pipeline_mode=pl.Buffered(1)),
            pl.BlockSpec(b.shape, lambda i: (0, 0), pipeline_mode=pl.Buffered(1)),
        ]

    footprint = _vmem_footprint_bytes(tb, in_dim, out_pad, x_itemsize, packed_params)
    vmem_limit = int(min(VMEM_BUDGET, max(32 * 1024 * 1024, footprint)))

    kernel = functools.partial(_fused_mlp_kernel, num_layers=num_layers)
    out = pl.pallas_call(
        kernel,
        out_shape=jax.ShapeDtypeStruct((B_pad, out_pad), jnp.float32),
        grid=(B_pad // tb,),
        in_specs=in_specs,
        out_specs=pl.BlockSpec((tb, out_pad), lambda i: (i, 0)),
        compiler_params=pltpu.CompilerParams(
            dimension_semantics=("parallel",),
            vmem_limit_bytes=vmem_limit),
    )(*flat_inputs)
    return out[:B]


def init_params(key, width_mult, depth_mult):
    """Deterministic Kaiming-normal init matching the PyTorch module.

    Layer 0: 3072 -> 128*w, gain=1 (nonlinearity='linear')
    Layers 1..depth_mult: 128*w -> 128*w, gain=sqrt(2) (relu)
    Last layer: 128*w -> 10, gain=sqrt(2) (relu)
    Biases are zeros. Weights stored as (in, out), f32 masters.
    """
    hidden = 128 * width_mult
    dims = [3072] + [hidden] * (depth_mult + 1) + [10]
    params = []
    for i in range(len(dims) - 1):
        fan_in, fan_out = dims[i], dims[i + 1]
        gain = 1.0 if i == 0 else 2.0 ** 0.5
        std = gain / float(fan_in) ** 0.5
        key, sub = jax.random.split(key)
        w = jax.random.normal(sub, (fan_in, fan_out), dtype=jnp.float32) * std
        b = jnp.zeros((fan_out,), dtype=jnp.float32)
        params.append((w, b))
    return params


def pack_params(params):
    """Kernel-ready params: bf16 (in, out) weights, (1, out) f32 biases.

    The last layer's out dim (10) is zero-padded to 128 lanes so the kernel's
    output tile is lane-dense; the wrapper slices the logits back to 10.
    """
    packed = []
    n = len(params)
    for i, (w, b) in enumerate(params):
        out_dim = w.shape[1]
        if i == n - 1 and out_dim % LANE != 0:
            pad = _round_up(out_dim, LANE) - out_dim
            w = jnp.pad(w, ((0, 0), (0, pad)))
            b = jnp.pad(b, (0, pad))
        packed.append((w.astype(jnp.bfloat16),
                       b.reshape(1, -1).astype(jnp.float32)))
    return packed


def simple_mlp_forward(x, packed_params, num_classes=10):
    """Forward pass: ReLU after every layer except the last. Returns (B, 10)."""
    out = fused_mlp_forward(x, packed_params)
    return out[:, :num_classes]


def simple_mlp_ref(x, packed_params, num_classes=10):
    """Pure-JAX reference with identical numerics (bf16 dots, f32 accum)."""
    n = len(packed_params)
    h = x if x.dtype == jnp.bfloat16 else x.astype(jnp.bfloat16)
    for i, (w, b) in enumerate(packed_params):
        y = jnp.dot(h, w, preferred_element_type=jnp.float32) + b
        if i < n - 1:
            h = jnp.maximum(y, 0.0).astype(jnp.bfloat16)
        else:
            h = y
    return h[:, :num_classes]


if __name__ == "__main__":
    width_mult = 1
    depth_mult = 2
    batch = 8

    key = jax.random.PRNGKey(0)
    key, xkey = jax.random.split(key)
    # CIFAR-10-like flattened input: (batch, 3*32*32) = (batch, 3072).
    # Produced directly in bf16 so the kernel's x stream is already half-width
    # (no wrapper-side astype, per the perf review).
    x = jax.random.normal(xkey, (batch, 3072), dtype=jnp.bfloat16)

    params = init_params(key, width_mult, depth_mult)
    packed = pack_params(params)

    out = jax.block_until_ready(simple_mlp_forward(x, packed))
    assert out.shape == (batch, 10), out.shape

    ref = jax.block_until_ready(simple_mlp_ref(x, packed))
    assert jnp.allclose(out, ref, atol=1e-2, rtol=1e-2), "mismatch vs JAX reference"

    print("KERNEL_OK")
</pallas_src>

<mosaic_0001>
module attributes {stable_mosaic.version = 11 : i64} {
  func.func @_fused_mlp_kernel(%arg0: i32, %arg1: memref<8x3072xbf16, #tpu.memory_space<vmem>>, %arg2: memref<3072x128xbf16, #tpu.memory_space<vmem>>, %arg3: memref<1x128xf32, #tpu.memory_space<vmem>>, %arg4: memref<128x128xbf16, #tpu.memory_space<vmem>>, %arg5: memref<1x128xf32, #tpu.memory_space<vmem>>, %arg6: memref<128x128xbf16, #tpu.memory_space<vmem>>, %arg7: memref<1x128xf32, #tpu.memory_space<vmem>>, %arg8: memref<128x128xbf16, #tpu.memory_space<vmem>>, %arg9: memref<1x128xf32, #tpu.memory_space<vmem>>, %arg10: memref<8x128xf32, #tpu.memory_space<vmem>>) attributes {dimension_semantics = [#tpu.dimension_semantics<parallel>], iteration_bounds = array<i64: 1>, scalar_prefetch = 0 : i64, scratch_operands = 0 : i64, tpu.core_type = #tpu.core_type<tc>, window_params = [{transform_indices = @transform_0, window_bounds = array<i64: 8, 3072>}, {pipeline_mode = #tpu.pipeline_mode<synchronous>, transform_indices = @transform_1, window_bounds = array<i64: 3072, 128>}, {pipeline_mode = #tpu.pipeline_mode<synchronous>, transform_indices = @transform_2, window_bounds = array<i64: 1, 128>}, {pipeline_mode = #tpu.pipeline_mode<synchronous>, transform_indices = @transform_3, window_bounds = array<i64: 128, 128>}, {pipeline_mode = #tpu.pipeline_mode<synchronous>, transform_indices = @transform_4, window_bounds = array<i64: 1, 128>}, {pipeline_mode = #tpu.pipeline_mode<synchronous>, transform_indices = @transform_5, window_bounds = array<i64: 128, 128>}, {pipeline_mode = #tpu.pipeline_mode<synchronous>, transform_indices = @transform_6, window_bounds = array<i64: 1, 128>}, {pipeline_mode = #tpu.pipeline_mode<synchronous>, transform_indices = @transform_7, window_bounds = array<i64: 128, 128>}, {pipeline_mode = #tpu.pipeline_mode<synchronous>, transform_indices = @transform_8, window_bounds = array<i64: 1, 128>}, {transform_indices = @transform_9, window_bounds = array<i64: 8, 128>}]} {
    %c0 = arith.constant 0 : index
    %c0_0 = arith.constant 0 : index
    %0 = vector.load %arg1[%c0, %c0_0] : memref<8x3072xbf16, #tpu.memory_space<vmem>>, vector<8x3072xbf16>
    %c0_1 = arith.constant 0 : index
    %c0_2 = arith.constant 0 : index
    %1 = vector.load %arg2[%c0_1, %c0_2] : memref<3072x128xbf16, #tpu.memory_space<vmem>>, vector<3072x128xbf16>
    %c0_3 = arith.constant 0 : index
    %c0_4 = arith.constant 0 : index
    %2 = vector.load %arg3[%c0_3, %c0_4] : memref<1x128xf32, #tpu.memory_space<vmem>>, vector<1x128xf32>
    %cst = arith.constant dense<0.000000e+00> : vector<8x128xf32>
    %3 = tpu.matmul %0, %1, %cst {dimension_numbers = #tpu.dot_dimension_numbers<[1], [0], [0], [1], [0, 0, 1, 1], [], []>} : vector<8x3072xbf16>, vector<3072x128xbf16>, vector<8x128xf32> -> vector<8x128xf32>
    %4 = vector.broadcast %2 : vector<1x128xf32> to vector<8x128xf32>
    %5 = arith.addf %3, %4 : vector<8x128xf32>
    %cst_5 = arith.constant 0.000000e+00 : f32
    %6 = vector.broadcast %cst_5 : f32 to vector<8x128xf32>
    %7 = arith.maximumf %5, %6 : vector<8x128xf32>
    %8 = arith.truncf %7 : vector<8x128xf32> to vector<8x128xbf16>
    %c0_6 = arith.constant 0 : index
    %c0_7 = arith.constant 0 : index
    %9 = vector.load %arg4[%c0_6, %c0_7] : memref<128x128xbf16, #tpu.memory_space<vmem>>, vector<128x128xbf16>
    %c0_8 = arith.constant 0 : index
    %c0_9 = arith.constant 0 : index
    %10 = vector.load %arg5[%c0_8, %c0_9] : memref<1x128xf32, #tpu.memory_space<vmem>>, vector<1x128xf32>
    %cst_10 = arith.constant dense<0.000000e+00> : vector<8x128xf32>
    %11 = tpu.matmul %8, %9, %cst_10 {dimension_numbers = #tpu.dot_dimension_numbers<[1], [0], [0], [1], [0, 0, 1, 1], [], []>} : vector<8x128xbf16>, vector<128x128xbf16>, vector<8x128xf32> -> vector<8x128xf32>
    %12 = vector.broadcast %10 : vector<1x128xf32> to vector<8x128xf32>
    %13 = arith.addf %11, %12 : vector<8x128xf32>
    %cst_11 = arith.constant 0.000000e+00 : f32
    %14 = vector.broadcast %cst_11 : f32 to vector<8x128xf32>
    %15 = arith.maximumf %13, %14 : vector<8x128xf32>
    %16 = arith.truncf %15 : vector<8x128xf32> to vector<8x128xbf16>
    %c0_12 = arith.constant 0 : index
    %c0_13 = arith.constant 0 : index
    %17 = vector.load %arg6[%c0_12, %c0_13] : memref<128x128xbf16, #tpu.memory_space<vmem>>, vector<128x128xbf16>
    %c0_14 = arith.constant 0 : index
    %c0_15 = arith.constant 0 : index
    %18 = vector.load %arg7[%c0_14, %c0_15] : memref<1x128xf32, #tpu.memory_space<vmem>>, vector<1x128xf32>
    %cst_16 = arith.constant dense<0.000000e+00> : vector<8x128xf32>
    %19 = tpu.matmul %16, %17, %cst_16 {dimension_numbers = #tpu.dot_dimension_numbers<[1], [0], [0], [1], [0, 0, 1, 1], [], []>} : vector<8x128xbf16>, vector<128x128xbf16>, vector<8x128xf32> -> vector<8x128xf32>
    %20 = vector.broadcast %18 : vector<1x128xf32> to vector<8x128xf32>
    %21 = arith.addf %19, %20 : vector<8x128xf32>
    %cst_17 = arith.constant 0.000000e+00 : f32
    %22 = vector.broadcast %cst_17 : f32 to vector<8x128xf32>
    %23 = arith.maximumf %21, %22 : vector<8x128xf32>
    %24 = arith.truncf %23 : vector<8x128xf32> to vector<8x128xbf16>
    %c0_18 = arith.constant 0 : index
    %c0_19 = arith.constant 0 : index
    %25 = vector.load %arg8[%c0_18, %c0_19] : memref<128x128xbf16, #tpu.memory_space<vmem>>, vector<128x128xbf16>
    %c0_20 = arith.constant 0 : index
    %c0_21 = arith.constant 0 : index
    %26 = vector.load %arg9[%c0_20, %c0_21] : memref<1x128xf32, #tpu.memory_space<vmem>>, vector<1x128xf32>
    %cst_22 = arith.constant dense<0.000000e+00> : vector<8x128xf32>
    %27 = tpu.matmul %24, %25, %cst_22 {dimension_numbers = #tpu.dot_dimension_numbers<[1], [0], [0], [1], [0, 0, 1, 1], [], []>} : vector<8x128xbf16>, vector<128x128xbf16>, vector<8x128xf32> -> vector<8x128xf32>
    %28 = vector.broadcast %26 : vector<1x128xf32> to vector<8x128xf32>
    %29 = arith.addf %27, %28 : vector<8x128xf32>
    %c0_23 = arith.constant 0 : index
    %c0_24 = arith.constant 0 : index
    %30 = vector.load %arg10[%c0_23, %c0_24] : memref<8x128xf32, #tpu.memory_space<vmem>>, vector<8x128xf32>
    tpu.vector_store %arg10[%c0_23, %c0_24], %29 {strides = array<i32>} : memref<8x128xf32, #tpu.memory_space<vmem>>, vector<8x128xf32>,
    return
  }
  func.func @transform_0(%arg0: i32) -> (i32, i32) {
    %c0_i32 = arith.constant 0 : i32
    %c0_i32_0 = arith.constant 0 : i32
    return %arg0, %c0_i32 : i32, i32
  }
  func.func @transform_1(%arg0: i32) -> (i32, i32) {
    %c0_i32 = arith.constant 0 : i32
    %c0_i32_0 = arith.constant 0 : i32
    %c0_i32_1 = arith.constant 0 : i32
    return %c0_i32, %c0_i32_0 : i32, i32
  }
  func.func @transform_2(%arg0: i32) -> (i32, i32) {
    %c0_i32 = arith.constant 0 : i32
    %c0_i32_0 = arith.constant 0 : i32
    %c0_i32_1 = arith.constant 0 : i32
    return %c0_i32, %c0_i32_0 : i32, i32
  }
  func.func @transform_3(%arg0: i32) -> (i32, i32) {
    %c0_i32 = arith.constant 0 : i32
    %c0_i32_0 = arith.constant 0 : i32
    %c0_i32_1 = arith.constant 0 : i32
    return %c0_i32, %c0_i32_0 : i32, i32
  }
  func.func @transform_4(%arg0: i32) -> (i32, i32) {
    %c0_i32 = arith.constant 0 : i32
    %c0_i32_0 = arith.constant 0 : i32
    %c0_i32_1 = arith.constant 0 : i32
    return %c0_i32, %c0_i32_0 : i32, i32
  }
  func.func @transform_5(%arg0: i32) -> (i32, i32) {
    %c0_i32 = arith.constant 0 : i32
    %c0_i32_0 = arith.constant 0 : i32
    %c0_i32_1 = arith.constant 0 : i32
    return %c0_i32, %c0_i32_0 : i32, i32
  }
  func.func @transform_6(%arg0: i32) -> (i32, i32) {
    %c0_i32 = arith.constant 0 : i32
    %c0_i32_0 = arith.constant 0 : i32
    %c0_i32_1 = arith.constant 0 : i32
    return %c0_i32, %c0_i32_0 : i32, i32
  }
  func.func @transform_7(%arg0: i32) -> (i32, i32) {
    %c0_i32 = arith.constant 0 : i32
    %c0_i32_0 = arith.constant 0 : i32
    %c0_i32_1 = arith.constant 0 : i32
    return %c0_i32, %c0_i32_0 : i32, i32
  }
  func.func @transform_8(%arg0: i32) -> (i32, i32) {
    %c0_i32 = arith.constant 0 : i32
    %c0_i32_0 = arith.constant 0 : i32
    %c0_i32_1 = arith.constant 0 : i32
    return %c0_i32, %c0_i32_0 : i32, i32
  }
  func.func @transform_9(%arg0: i32) -> (i32, i32) {
    %c0_i32 = arith.constant 0 : i32
    %c0_i32_0 = arith.constant 0 : i32
    return %arg0, %c0_i32 : i32, i32
  }
}

</mosaic_0001>

<bundles_post_ra>
// kernel: tpu_custom_call.1
= control target key start
LH: loop header
LB: loop body
LE: loop exit
PB: predicated region body
PF: predicated region fallthrough
CT: control target
= control target key end

     0   :  { %14 = vsyncpa [#allocation3], 0  ;;  %s3658_s0 = inlined_call_operand.hbm [shape: bf16[8,3072], index: 0, kind: input, shape index: {}]   ;;  %s3659_s1 = inlined_call_operand.hbm [shape: bf16[3072,128], index: 1, kind: input, shape index: {}]   ;;  %s3660_s2 = inlined_call_operand.vmem [shape: f32[1,128], index: 2, kind: input, shape index: {}]   ;;  %s3661_s3 = inlined_call_operand.hbm [shape: bf16[128,128], index: 3, kind: input, shape index: {}]   ;;  %s3662_s4 = inlined_call_operand.vmem [shape: f32[1,128], index: 4, kind: input, shape index: {}]   ;;  %s3663_s5 = inlined_call_operand.hbm [shape: bf16[128,128], index: 5, kind: input, shape index: {}]   ;;  %s3664_s6 = inlined_call_operand.vmem [shape: f32[1,128], index: 6, kind: input, shape index: {}]   ;;  %s3665_s7 = inlined_call_operand.hbm [shape: bf16[128,128], index: 7, kind: input, shape index: {}]   ;;  %s3666_s8 = inlined_call_operand.vmem [shape: f32[1,128], index: 8, kind: input, shape index: {}]   ;;  %s3667_s9 = inlined_call_operand.hbm [shape: f32[8,128], index: 9, kind: output, shape index: {}]  }
   0x1   :  { %15 = vsyncpa [#allocation6], 0 }
   0x2   :  { %16 = vsyncpa [#allocation9], 0  ;;  %s33_s11 = sshll.u32 %s3659_s1, 4  ;;  %s34_s11 = int_to_ptr.hbm [resolvable:$true] %s33_s11 }
   0x3   :  { %17 = vsyncpa [#allocation4], 0  ;;  %s3570_s12 = smov [#allocation5]   ;;  %s63_s16 = sshll.u32 %s3663_s5, 4  ;;  %s64_s16 = int_to_ptr.hbm [resolvable:$true] %s63_s16 }
   0x4   :  { %s35_s13 = sshll.u32 %s3570_s12, 4  ;;  %s3571_s17 = smov 64   ;;  %s36_s13 = int_to_ptr.vmem [resolvable:$true] %s35_s13 }
   0x5   :  { %s3572_s18 = smov 4   ;;  %s3573_s19 = smov [#allocation8]  }
   0x6   :  { %41 = dma.hbm_to_vmem [thread:$0]  %s34_s11, 24576, %s36_s13, [#allocation6], %s3571_s17, %s3571_s17, %s3572_s18  }
   0x7   :  { %s65_s20 = sshll.u32 %s3573_s19, 4  ;;  %s23_s23 = sshll.u32 %s3658_s0, 4  ;;  %s66_s20 = int_to_ptr.vmem [resolvable:$true] %s65_s20  ;;  %s24_s23 = int_to_ptr.hbm [resolvable:$true] %s23_s23 }
   0x8   :  { %71 = dma.hbm_to_vmem [thread:$0]  %s64_s16, 1024, %s66_s20, [#allocation9], %s3571_s17, %s3571_s17, %s3572_s18  }
   0x9   :  { %s48_s25 = sshll.u32 %s3661_s3, 4  ;;  %s3574_s26 = smov [#allocation2]   ;;  %s49_s25 = int_to_ptr.hbm [resolvable:$true] %s48_s25 }
   0xa   :  { %s25_s27 = sshll.u32 %s3574_s26, 4  ;;  %s3575_s5 = smov [#allocation7]   ;;  %s26_s27 = int_to_ptr.vmem [resolvable:$true] %s25_s27 }
   0xb   :  { %28 = dma.hbm_to_vmem [thread:$0]  %s24_s23, 1536, %s26_s27, [#allocation3]  }
   0xc   :  { %s50_s28 = sshll.u32 %s3575_s5, 4  ;;  %s78_s10 = sshll.u32 %s3665_s7, 4  ;;  %s51_s28 = int_to_ptr.vmem [resolvable:$true] %s50_s28  ;;  %s79_s10 = int_to_ptr.hbm [resolvable:$true] %s78_s10 }
   0xd   :  { %56 = dma.hbm_to_vmem [thread:$0]  %s49_s25, 1024, %s51_s28, [#allocation6], %s3571_s17, %s3571_s17, %s3572_s18  }
   0xe   :  { %s3576_s0 = smov [#allocation10]  }
   0xf   :  { %s80_s11 = sshll.u32 %s3576_s0, 4  ;;  %s81_s11 = int_to_ptr.vmem [resolvable:$true] %s80_s11 }
  0x10   :  { %86 = dma.hbm_to_vmem [thread:$0]  %s79_s10, 1024, %s81_s11, [#allocation9], %s3571_s17, %s3571_s17, %s3572_s18  }
  0x11   :  { %3562 = dma.done.wait [#allocation3], 1536  }
  0x12   :  { %3563 = vsyncadd [#allocation3], 4294965760 }
  0x13   :  { %3564 = dma.done.wait [#allocation6], 25600  }
  0x14   :  { %3565 = vsyncadd [#allocation6], 4294941696 }
  0x15   :  { %3566 = dma.done.wait [#allocation9], 2048  }
  0x16   :  { %3567 = vsyncadd [#allocation9], 4294965248  ;;  %v3197_v0 = vld [vmem:[#allocation5 + $0x38] sm:$0xff]  ;;  %v3196_v4 = vld [vmem:[#allocation5 + $0x30] sm:$0xff]  ;;  %s3577_s16 = smov [#allocation11]   ;;  %s2314_s20 = sshll.u32 %s3667_s9, 4  ;;  %s2315_s20 = int_to_ptr.hbm [resolvable:$true] %s2314_s20 }
  0x17   :  { %v3205_v1 = vld [vmem:[#allocation5 + $0x78] sm:$0xff]  ;;  %1745 = vmatpush.bf16.msra.mxu0 %v3197_v0  ;;  %v3204_v5 = vld [vmem:[#allocation5 + $0x70] sm:$0xff]  ;;  %v3195_v8 = vld [vmem:[#allocation5 + $0x28] sm:$0xff]  ;;  %s2312_s17 = sshll.u32 %s3577_s16, 4  ;;  %s2313_s17 = int_to_ptr.vmem [resolvable:$true] %s2312_s17 }
  0x18   :  { %v3213_v2 = vld [vmem:[#allocation5 + $0xb8] sm:$0xff]  ;;  %1758 = vmatpush.bf16.msra.mxu1 %v3205_v1  ;;  %v3212_v6 = vld [vmem:[#allocation5 + $0xb0] sm:$0xff]  ;;  %v3203_v9 = vld [vmem:[#allocation5 + $0x68] sm:$0xff] }
  0x19   :  { %v3221_v3 = vld [vmem:[#allocation5 + $0xf8] sm:$0xff]  ;;  %1771 = vmatpush.bf16.msra.mxu2 %v3213_v2  ;;  %v3220_v7 = vld [vmem:[#allocation5 + $0xf0] sm:$0xff]  ;;  %v3211_v10 = vld [vmem:[#allocation5 + $0xa8] sm:$0xff] }
  0x1a   :  { %1784 = vmatpush.bf16.msra.mxu3 %v3221_v3  ;;  %v3219_v11 = vld [vmem:[#allocation5 + $0xe8] sm:$0xff]  ;;  %v3194_v12 = vld [vmem:[#allocation5 + $0x20] sm:$0xff]  ;;  %v3193_v16 = vld [vmem:[#allocation5 + $0x18] sm:$0xff] }
  0x1b   :  { %1746 = vmatpush.bf16.msra.mxu0 %v3196_v4  ;;  %v3202_v13 = vld [vmem:[#allocation5 + $0x60] sm:$0xff]  ;;  %v3201_v17 = vld [vmem:[#allocation5 + $0x58] sm:$0xff]  ;;  %v3192_v20 = vld [vmem:[#allocation5 + $0x10] sm:$0xff] }
  0x1c   :  { %1759 = vmatpush.bf16.msra.mxu1 %v3204_v5  ;;  %v3210_v14 = vld [vmem:[#allocation5 + $0xa0] sm:$0xff]  ;;  %v3209_v18 = vld [vmem:[#allocation5 + $0x98] sm:$0xff]  ;;  %v3200_v21 = vld [vmem:[#allocation5 + $0x50] sm:$0xff] }
  0x1d   :  { %1772 = vmatpush.bf16.msra.mxu2 %v3212_v6  ;;  %v3218_v15 = vld [vmem:[#allocation5 + $0xe0] sm:$0xff]  ;;  %v3217_v19 = vld [vmem:[#allocation5 + $0xd8] sm:$0xff]  ;;  %v3208_v22 = vld [vmem:[#allocation5 + $0x90] sm:$0xff] }
  0x1e   :  { %1785 = vmatpush.bf16.msra.mxu3 %v3220_v7  ;;  %v3216_v23 = vld [vmem:[#allocation5 + $0xd0] sm:$0xff]  ;;  %v3191_v24 = vld [vmem:[#allocation5 + $0x8] sm:$0xff]  ;;  %v109_v29 = vld [vmem:[#allocation2] sm:$0xff] }
  0x1f   :  { %1747 = vmatpush.bf16.msra.mxu0 %v3195_v8  ;;  %v3199_v25 = vld [vmem:[#allocation5 + $0x48] sm:$0xff]  ;;  %v3190_v30 = vld [vmem:[#allocation5] sm:$0xff]  ;;  %v521_v33 = vunpack.c.l.b16 %v109_v29  ;;  %v522_v37 = vunpack.c.h.b16 %v109_v29  ;;  %v3229_v38 = vld [vmem:[#allocation5 + $0x138] sm:$0xff] }
  0x20   :  { %1760 = vmatpush.bf16.msra.mxu1 %v3203_v9  ;;  %v3207_v26 = vld [vmem:[#allocation5 + $0x88] sm:$0xff]  ;;  %v3198_v31 = vld [vmem:[#allocation5 + $0x40] sm:$0xff]  ;;  %v3237_v39 = vld [vmem:[#allocation5 + $0x178] sm:$0xff] }
  0x21   :  { %1773 = vmatpush.bf16.msra.mxu2 %v3211_v10  ;;  %v3215_v27 = vld [vmem:[#allocation5 + $0xc8] sm:$0xff]  ;;  %v3206_v34 = vld [vmem:[#allocation5 + $0x80] sm:$0xff]  ;;  %v3245_v40 = vld [vmem:[#allocation5 + $0x1b8] sm:$0xff]  ;;  %v545_v43 = vpack.c.b16 %v521_v33, %v521_v33  ;;  %v546_v45 = vpack.c.b16 %v522_v37, %v522_v37 }
  0x22   :  { %1786 = vmatpush.bf16.msra.mxu3 %v3219_v11  ;;  %v110_v28 = vld [vmem:[#allocation2 + $0x8] sm:$0xff]  ;;  %v3214_v35 = vld [vmem:[#allocation5 + $0xc0] sm:$0xff]  ;;  %v3253_v41 = vld [vmem:[#allocation5 + $0x1f8] sm:$0xff] }
  0x23   :  { %1748 = vmatpush.bf16.msra.mxu0 %v3194_v12  ;;  %v523_v32 = vunpack.c.l.b16 %v110_v28  ;;  %v524_v36 = vunpack.c.h.b16 %v110_v28  ;;  %v3228_v46 = vld [vmem:[#allocation5 + $0x130] sm:$0xff]  ;;  %v3227_v50 = vld [vmem:[#allocation5 + $0x128] sm:$0xff]  ;;  %v3226_v54 = vld [vmem:[#allocation5 + $0x120] sm:$0xff] }
  0x24   :  { %1761 = vmatpush.bf16.msra.mxu1 %v3202_v13  ;;  %v3236_v47 = vld [vmem:[#allocation5 + $0x170] sm:$0xff]  ;;  %v3235_v51 = vld [vmem:[#allocation5 + $0x168] sm:$0xff]  ;;  %v3234_v55 = vld [vmem:[#allocation5 + $0x160] sm:$0xff] }
  0x25   :  { %1774 = vmatpush.bf16.msra.mxu2 %v3210_v14  ;;  %v547_v42 = vpack.c.b16 %v523_v32, %v523_v32  ;;  %v548_v44 = vpack.c.b16 %v524_v36, %v524_v36  ;;  %v3244_v48 = vld [vmem:[#allocation5 + $0x1b0] sm:$0xff]  ;;  %v3243_v52 = vld [vmem:[#allocation5 + $0x1a8] sm:$0xff]  ;;  %v3242_v56 = vld [vmem:[#allocation5 + $0x1a0] sm:$0xff] }
  0x26   :  { %1787 = vmatpush.bf16.msra.mxu3 %v3218_v15  ;;  %v3252_v49 = vld [vmem:[#allocation5 + $0x1f0] sm:$0xff]  ;;  %v3251_v53 = vld [vmem:[#allocation5 + $0x1e8] sm:$0xff]  ;;  %v3250_v57 = vld [vmem:[#allocation5 + $0x1e0] sm:$0xff] }
  0x27   :  { %1749 = vmatpush.bf16.msra.mxu0 %v3193_v16  ;;  %v3225_v58 = vld [vmem:[#allocation5 + $0x118] sm:$0xff]  ;;  %v3224_v62 = vld [vmem:[#allocation5 + $0x110] sm:$0xff]  ;;  %v3223_v2 = vld [vmem:[#allocation5 + $0x108] sm:$0xff] }
  0x28   :  { %1762 = vmatpush.bf16.msra.mxu1 %v3201_v17  ;;  %v3233_v59 = vld [vmem:[#allocation5 + $0x158] sm:$0xff]  ;;  %v3232_v63 = vld [vmem:[#allocation5 + $0x150] sm:$0xff]  ;;  %v3231_v3 = vld [vmem:[#allocation5 + $0x148] sm:$0xff] }
  0x29   :  { %1775 = vmatpush.bf16.msra.mxu2 %v3209_v18  ;;  %v3241_v60 = vld [vmem:[#allocation5 + $0x198] sm:$0xff]  ;;  %v3240_v0 = vld [vmem:[#allocation5 + $0x190] sm:$0xff]  ;;  %v3239_v4 = vld [vmem:[#allocation5 + $0x188] sm:$0xff] }
  0x2a   :  { %1788 = vmatpush.bf16.msra.mxu3 %v3217_v19  ;;  %v3249_v61 = vld [vmem:[#allocation5 + $0x1d8] sm:$0xff]  ;;  %v3248_v1 = vld [vmem:[#allocation5 + $0x1d0] sm:$0xff]  ;;  %v3247_v5 = vld [vmem:[#allocation5 + $0x1c8] sm:$0xff] }
  0x2b   :  { %1750 = vmatpush.bf16.msra.mxu0 %v3192_v20  ;;  %v112_v6 = vld [vmem:[#allocation2 + $0x18] sm:$0xff]  ;;  %v111_v7 = vld [vmem:[#allocation2 + $0x10] sm:$0xff]  ;;  %v3222_v8 = vld [vmem:[#allocation5 + $0x100] sm:$0xff] }
  0x2c   :  { %1763 = vmatpush.bf16.msra.mxu1 %v3200_v21  ;;  %v3230_v9 = vld [vmem:[#allocation5 + $0x140] sm:$0xff]  ;;  %v527_v10 = vunpack.c.l.b16 %v112_v6  ;;  %v525_v11 = vunpack.c.l.b16 %v111_v7  ;;  %v528_v14 = vunpack.c.h.b16 %v112_v6  ;;  %v526_v15 = vunpack.c.h.b16 %v111_v7  ;;  %v3261_v16 = vld [vmem:[#allocation5 + $0x238] sm:$0xff]  ;;  %v3259_v28 = vld [vmem:[#allocation5 + $0x228] sm:$0xff] }
  0x2d   :  { %1776 = vmatpush.bf16.msra.mxu2 %v3208_v22  ;;  %v3238_v12 = vld [vmem:[#allocation5 + $0x180] sm:$0xff]  ;;  %v3269_v17 = vld [vmem:[#allocation5 + $0x278] sm:$0xff]  ;;  %v3267_v29 = vld [vmem:[#allocation5 + $0x268] sm:$0xff] }
  0x2e   :  { %1789 = vmatpush.bf16.msra.mxu3 %v3216_v23  ;;  %v3246_v13 = vld [vmem:[#allocation5 + $0x1c0] sm:$0xff]  ;;  %v3277_v18 = vld [vmem:[#allocation5 + $0x2b8] sm:$0xff]  ;;  %v551_v20 = vpack.c.b16 %v527_v10, %v527_v10  ;;  %v549_v21 = vpack.c.b16 %v525_v11, %v525_v11  ;;  %v552_v22 = vpack.c.b16 %v528_v14, %v528_v14  ;;  %v550_v23 = vpack.c.b16 %v526_v15, %v526_v15  ;;  %v3291_v6 = vld [vmem:[#allocation5 + $0x328] sm:$0xff] }
  0x2f   :  { %1751 = vmatpush.bf16.msra.mxu0 %v3191_v24  ;;  %v3285_v19 = vld [vmem:[#allocation5 + $0x2f8] sm:$0xff]  ;;  %v3260_v24 = vld [vmem:[#allocation5 + $0x230] sm:$0xff]  ;;  %v3258_v32 = vld [vmem:[#allocation5 + $0x220] sm:$0xff] }
  0x30   :  { %1764 = vmatpush.bf16.msra.mxu1 %v3199_v25  ;;  %v3268_v25 = vld [vmem:[#allocation5 + $0x270] sm:$0xff]  ;;  %v3266_v33 = vld [vmem:[#allocation5 + $0x260] sm:$0xff]  ;;  %v3257_v36 = vld [vmem:[#allocation5 + $0x218] sm:$0xff] }
  0x31   :  { %1777 = vmatpush.bf16.msra.mxu2 %v3207_v26  ;;  %v3276_v26 = vld [vmem:[#allocation5 + $0x2b0] sm:$0xff]  ;;  %v3265_v37 = vld [vmem:[#allocation5 + $0x258] sm:$0xff]  ;;  %v3299_v7 = vld [vmem:[#allocation5 + $0x368] sm:$0xff] }
  0x32   :  { %1790 = vmatpush.bf16.msra.mxu3 %v3215_v27  ;;  %v3284_v27 = vld [vmem:[#allocation5 + $0x2f0] sm:$0xff]  ;;  %v3290_v10 = vld [vmem:[#allocation5 + $0x320] sm:$0xff]  ;;  %v3289_v14 = vld [vmem:[#allocation5 + $0x318] sm:$0xff] }
  0x33   :  { %1752 = vmatpush.bf16.msra.mxu0 %v3190_v30  ;;  %v3275_v30 = vld [vmem:[#allocation5 + $0x2a8] sm:$0xff]  ;;  %v3298_v11 = vld [vmem:[#allocation5 + $0x360] sm:$0xff]  ;;  %v3297_v15 = vld [vmem:[#allocation5 + $0x358] sm:$0xff] }
  0x34   :  { %1765 = vmatpush.bf16.msra.mxu1 %v3198_v31  ;;  %v3283_v31 = vld [vmem:[#allocation5 + $0x2e8] sm:$0xff] }
  0x35   :  { %1778 = vmatpush.bf16.msra.mxu2 %v3206_v34  ;;  %v3274_v34 = vld [vmem:[#allocation5 + $0x2a0] sm:$0xff] }
  0x36   :  { %1791 = vmatpush.bf16.msra.mxu3 %v3214_v35  ;;  %1753 = vmatmul.bf16.vlgmr.msra.gmra.mxu0 %v545_v43  ;;  %v3282_v35 = vld [vmem:[#allocation5 + $0x2e0] sm:$0xff]  ;;  %v3280_v43 = vld [vmem:[#allocation5 + $0x2d0] sm:$0xff] }
  0x37   :  { %1797 = vmatpush.bf16.msrb.mxu0 %v3229_v38  ;;  %1766 = vmatmul.bf16.vlgmr.msra.gmra.mxu1 %v546_v45  ;;  %v3273_v38 = vld [vmem:[#allocation5 + $0x298] sm:$0xff]  ;;  %v3263_v45 = vld [vmem:[#allocation5 + $0x248] sm:$0xff] }
  0x38   :  { %1810 = vmatpush.bf16.msrb.mxu1 %v3237_v39  ;;  %1779 = vmatmul.bf16.vlgmr.msra.gmra.mxu2 %v547_v42  ;;  %v3281_v39 = vld [vmem:[#allocation5 + $0x2d8] sm:$0xff]  ;;  %v3272_v42 = vld [vmem:[#allocation5 + $0x290] sm:$0xff] }
  0x39   :  { %1823 = vmatpush.bf16.msrb.mxu2 %v3245_v40  ;;  %1792 = vmatmul.bf16.vlgmr.msra.gmra.mxu3 %v548_v44  ;;  %v3256_v40 = vld [vmem:[#allocation5 + $0x210] sm:$0xff]  ;;  %v3255_v44 = vld [vmem:[#allocation5 + $0x208] sm:$0xff] }
  0x3a   :  { %1836 = vmatpush.bf16.msrb.mxu3 %v3253_v41  ;;  %v3264_v41 = vld [vmem:[#allocation5 + $0x250] sm:$0xff] }
  0x3b   :  { %1798 = vmatpush.bf16.msrb.mxu0 %v3228_v46  ;;  %v3271_v46 = vld [vmem:[#allocation5 + $0x288] sm:$0xff] }
  0x3c   :  { %1811 = vmatpush.bf16.msrb.mxu1 %v3236_v47  ;;  %v3279_v47 = vld [vmem:[#allocation5 + $0x2c8] sm:$0xff] }
  0x3d   :  { %1824 = vmatpush.bf16.msrb.mxu2 %v3244_v48  ;;  %v113_v48 = vld [vmem:[#allocation2 + $0x20] sm:$0xff] }
  0x3e   :  { %1837 = vmatpush.bf16.msrb.mxu3 %v3252_v49  ;;  %v114_v49 = vld [vmem:[#allocation2 + $0x28] sm:$0xff] }
  0x3f   :  { %1799 = vmatpush.bf16.msrb.mxu0 %v3227_v50  ;;  %v3254_v50 = vld [vmem:[#allocation5 + $0x200] sm:$0xff] }
  0x40   :  { %1812 = vmatpush.bf16.msrb.mxu1 %v3235_v51  ;;  %v3262_v51 = vld [vmem:[#allocation5 + $0x240] sm:$0xff] }
  0x41   :  { %1825 = vmatpush.bf16.msrb.mxu2 %v3243_v52  ;;  %v529_v52 = vunpack.c.l.b16 %v113_v48 }
  0x42   :  { %1838 = vmatpush.bf16.msrb.mxu3 %v3251_v53  ;;  %v531_v53 = vunpack.c.l.b16 %v114_v49 }
  0x43   :  { %1800 = vmatpush.bf16.msrb.mxu0 %v3226_v54  ;;  %v3270_v54 = vld [vmem:[#allocation5 + $0x280] sm:$0xff] }
  0x44   :  { %1813 = vmatpush.bf16.msrb.mxu1 %v3234_v55  ;;  %v3278_v55 = vld [vmem:[#allocation5 + $0x2c0] sm:$0xff] }
  0x45   :  { %1826 = vmatpush.bf16.msrb.mxu2 %v3242_v56  ;;  %v530_v56 = vunpack.c.h.b16 %v113_v48  ;;  %v3323_v48 = vld [vmem:[#allocation5 + $0x428] sm:$0xff] }
  0x46   :  { %1839 = vmatpush.bf16.msrb.mxu3 %v3250_v57  ;;  %v532_v57 = vunpack.c.h.b16 %v114_v49  ;;  %v3331_v49 = vld [vmem:[#allocation5 + $0x468] sm:$0xff] }
  0x47   :  { %1801 = vmatpush.bf16.msrb.mxu0 %v3225_v58  ;;  %v3293_v58 = vld [vmem:[#allocation5 + $0x338] sm:$0xff] }
  0x48   :  { %1814 = vmatpush.bf16.msrb.mxu1 %v3233_v59  ;;  %v3301_v59 = vld [vmem:[#allocation5 + $0x378] sm:$0xff] }
  0x49   :  { %1827 = vmatpush.bf16.msrb.mxu2 %v3241_v60  ;;  %v3309_v60 = vld [vmem:[#allocation5 + $0x3b8] sm:$0xff] }
  0x4a   :  { %1840 = vmatpush.bf16.msrb.mxu3 %v3249_v61  ;;  %v3317_v61 = vld [vmem:[#allocation5 + $0x3f8] sm:$0xff] }
  0x4b   :  { %1802 = vmatpush.bf16.msrb.mxu0 %v3224_v62  ;;  %v553_v62 = vpack.c.b16 %v529_v52, %v529_v52  ;;  %v3322_v52 = vld [vmem:[#allocation5 + $0x420] sm:$0xff] }
  0x4c   :  { %1815 = vmatpush.bf16.msrb.mxu1 %v3232_v63  ;;  %v555_v63 = vpack.c.b16 %v531_v53, %v531_v53  ;;  %v3330_v53 = vld [vmem:[#allocation5 + $0x460] sm:$0xff] }
  0x4d   :  { %1828 = vmatpush.bf16.msrb.mxu2 %v3240_v0  ;;  %v554_v0 = vpack.c.b16 %v530_v56, %v530_v56  ;;  %v3321_v56 = vld [vmem:[#allocation5 + $0x418] sm:$0xff] }
  0x4e   :  { %1841 = vmatpush.bf16.msrb.mxu3 %v3248_v1  ;;  %v556_v1 = vpack.c.b16 %v532_v57, %v532_v57  ;;  %v3329_v57 = vld [vmem:[#allocation5 + $0x458] sm:$0xff] }
  0x4f   :  { %1803 = vmatpush.bf16.msrb.mxu0 %v3223_v2  ;;  %v3292_v2 = vld [vmem:[#allocation5 + $0x330] sm:$0xff] }
  0x50   :  { %1816 = vmatpush.bf16.msrb.mxu1 %v3231_v3  ;;  %v3300_v3 = vld [vmem:[#allocation5 + $0x370] sm:$0xff] }
  0x51   :  { %1829 = vmatpush.bf16.msrb.mxu2 %v3239_v4  ;;  %v3308_v4 = vld [vmem:[#allocation5 + $0x3b0] sm:$0xff] }
  0x52   :  { %1842 = vmatpush.bf16.msrb.mxu3 %v3247_v5  ;;  %v3316_v5 = vld [vmem:[#allocation5 + $0x3f0] sm:$0xff] }
  0x53   :  { %1804 = vmatpush.bf16.msrb.mxu0 %v3222_v8  ;;  %v3307_v8 = vld [vmem:[#allocation5 + $0x3a8] sm:$0xff] }
  0x54   :  { %1817 = vmatpush.bf16.msrb.mxu1 %v3230_v9  ;;  %v3315_v9 = vld [vmem:[#allocation5 + $0x3e8] sm:$0xff] }
  0x55   :  { %1830 = vmatpush.bf16.msrb.mxu2 %v3238_v12  ;;  %v3306_v12 = vld [vmem:[#allocation5 + $0x3a0] sm:$0xff] }
  0x56   :  { %1843 = vmatpush.bf16.msrb.mxu3 %v3246_v13  ;;  %1805 = vmatmul.bf16.vlgmr.msrb.gmra.mxu0 %v549_v21  ;;  %v3314_v13 = vld [vmem:[#allocation5 + $0x3e0] sm:$0xff]  ;;  %v3312_v21 = vld [vmem:[#allocation5 + $0x3d0] sm:$0xff] }
  0x57   :  { %1849 = vmatpush.bf16.msra.mxu0 %v3261_v16  ;;  %1818 = vmatmul.bf16.vlgmr.msrb.gmra.mxu1 %v550_v23  ;;  %v3305_v16 = vld [vmem:[#allocation5 + $0x398] sm:$0xff]  ;;  %v3295_v23 = vld [vmem:[#allocation5 + $0x348] sm:$0xff] }
  0x58   :  { %1862 = vmatpush.bf16.msra.mxu1 %v3269_v17  ;;  %1831 = vmatmul.bf16.vlgmr.msrb.gmra.mxu2 %v551_v20  ;;  %v3313_v17 = vld [vmem:[#allocation5 + $0x3d8] sm:$0xff]  ;;  %v3304_v20 = vld [vmem:[#allocation5 + $0x390] sm:$0xff] }
  0x59   :  { %1875 = vmatpush.bf16.msra.mxu2 %v3277_v18  ;;  %1844 = vmatmul.bf16.vlgmr.msrb.gmra.mxu3 %v552_v22  ;;  %v3288_v18 = vld [vmem:[#allocation5 + $0x310] sm:$0xff]  ;;  %v3287_v22 = vld [vmem:[#allocation5 + $0x308] sm:$0xff] }
  0x5a   :  { %1888 = vmatpush.bf16.msra.mxu3 %v3285_v19  ;;  %v3296_v19 = vld [vmem:[#allocation5 + $0x350] sm:$0xff] }
  0x5b   :  { %1850 = vmatpush.bf16.msra.mxu0 %v3260_v24  ;;  %v3303_v24 = vld [vmem:[#allocation5 + $0x388] sm:$0xff] }
  0x5c   :  { %1863 = vmatpush.bf16.msra.mxu1 %v3268_v25  ;;  %v3311_v25 = vld [vmem:[#allocation5 + $0x3c8] sm:$0xff] }
  0x5d   :  { %1876 = vmatpush.bf16.msra.mxu2 %v3276_v26  ;;  %v115_v26 = vld [vmem:[#allocation2 + $0x30] sm:$0xff] }
  0x5e   :  { %1889 = vmatpush.bf16.msra.mxu3 %v3284_v27  ;;  %v116_v27 = vld [vmem:[#allocation2 + $0x38] sm:$0xff] }
  0x5f   :  { %1851 = vmatpush.bf16.msra.mxu0 %v3259_v28  ;;  %v3286_v28 = vld [vmem:[#allocation5 + $0x300] sm:$0xff] }
  0x60   :  { %1864 = vmatpush.bf16.msra.mxu1 %v3267_v29  ;;  %v3294_v29 = vld [vmem:[#allocation5 + $0x340] sm:$0xff] }
  0x61   :  { %1877 = vmatpush.bf16.msra.mxu2 %v3275_v30  ;;  %v533_v30 = vunpack.c.l.b16 %v115_v26 }
  0x62   :  { %1890 = vmatpush.bf16.msra.mxu3 %v3283_v31  ;;  %v535_v31 = vunpack.c.l.b16 %v116_v27 }
  0x63   :  { %1852 = vmatpush.bf16.msra.mxu0 %v3258_v32  ;;  %v3302_v32 = vld [vmem:[#allocation5 + $0x380] sm:$0xff] }
  0x64   :  { %1865 = vmatpush.bf16.msra.mxu1 %v3266_v33  ;;  %v3310_v33 = vld [vmem:[#allocation5 + $0x3c0] sm:$0xff] }
  0x65   :  { %1878 = vmatpush.bf16.msra.mxu2 %v3274_v34  ;;  %v534_v34 = vunpack.c.h.b16 %v115_v26  ;;  %v3355_v26 = vld [vmem:[#allocation5 + $0x528] sm:$0xff] }
  0x66   :  { %1891 = vmatpush.bf16.msra.mxu3 %v3282_v35  ;;  %v536_v35 = vunpack.c.h.b16 %v116_v27  ;;  %v3363_v27 = vld [vmem:[#allocation5 + $0x568] sm:$0xff] }
  0x67   :  { %1853 = vmatpush.bf16.msra.mxu0 %v3257_v36  ;;  %v3325_v36 = vld [vmem:[#allocation5 + $0x438] sm:$0xff] }
  0x68   :  { %1866 = vmatpush.bf16.msra.mxu1 %v3265_v37  ;;  %v3333_v37 = vld [vmem:[#allocation5 + $0x478] sm:$0xff] }
  0x69   :  { %1879 = vmatpush.bf16.msra.mxu2 %v3273_v38  ;;  %v3341_v38 = vld [vmem:[#allocation5 + $0x4b8] sm:$0xff] }
  0x6a   :  { %1892 = vmatpush.bf16.msra.mxu3 %v3281_v39  ;;  %v3349_v39 = vld [vmem:[#allocation5 + $0x4f8] sm:$0xff] }
  0x6b   :  { %1854 = vmatpush.bf16.msra.mxu0 %v3256_v40  ;;  %v557_v40 = vpack.c.b16 %v533_v30, %v533_v30  ;;  %v3379_v30 = vld [vmem:[#allocation5 + $0x5e8] sm:$0xff] }
  0x6c   :  { %1867 = vmatpush.bf16.msra.mxu1 %v3264_v41  ;;  %v559_v41 = vpack.c.b16 %v535_v31, %v535_v31 }
  0x6d   :  { %1880 = vmatpush.bf16.msra.mxu2 %v3272_v42  ;;  %v558_v42 = vpack.c.b16 %v534_v34, %v534_v34 }
  0x6e   :  { %1893 = vmatpush.bf16.msra.mxu3 %v3280_v43  ;;  %v560_v43 = vpack.c.b16 %v536_v35, %v536_v35 }
  0x6f   :  { %1855 = vmatpush.bf16.msra.mxu0 %v3255_v44  ;;  %v3324_v44 = vld [vmem:[#allocation5 + $0x430] sm:$0xff] }
  0x70   :  { %1868 = vmatpush.bf16.msra.mxu1 %v3263_v45  ;;  %v3332_v45 = vld [vmem:[#allocation5 + $0x470] sm:$0xff] }
  0x71   :  { %1881 = vmatpush.bf16.msra.mxu2 %v3271_v46  ;;  %v3340_v46 = vld [vmem:[#allocation5 + $0x4b0] sm:$0xff] }
  0x72   :  { %1894 = vmatpush.bf16.msra.mxu3 %v3279_v47  ;;  %v3348_v47 = vld [vmem:[#allocation5 + $0x4f0] sm:$0xff] }
  0x73   :  { %1856 = vmatpush.bf16.msra.mxu0 %v3254_v50  ;;  %v3339_v50 = vld [vmem:[#allocation5 + $0x4a8] sm:$0xff] }
  0x74   :  { %1869 = vmatpush.bf16.msra.mxu1 %v3262_v51  ;;  %v3347_v51 = vld [vmem:[#allocation5 + $0x4e8] sm:$0xff] }
  0x75   :  { %1882 = vmatpush.bf16.msra.mxu2 %v3270_v54  ;;  %v3338_v54 = vld [vmem:[#allocation5 + $0x4a0] sm:$0xff] }
  0x76   :  { %1895 = vmatpush.bf16.msra.mxu3 %v3278_v55  ;;  %1857 = vmatmul.bf16.vlgmr.msra.gmra.mxu0 %v553_v62  ;;  %v3346_v55 = vld [vmem:[#allocation5 + $0x4e0] sm:$0xff]  ;;  %v3336_v62 = vld [vmem:[#allocation5 + $0x490] sm:$0xff] }
  0x77   :  { %1901 = vmatpush.bf16.msrb.mxu0 %v3293_v58  ;;  %1870 = vmatmul.bf16.vlgmr.msra.gmra.mxu1 %v554_v0  ;;  %v3337_v58 = vld [vmem:[#allocation5 + $0x498] sm:$0xff]  ;;  %v3319_v0 = vld [vmem:[#allocation5 + $0x408] sm:$0xff] }
  0x78   :  { %1914 = vmatpush.bf16.msrb.mxu1 %v3301_v59  ;;  %1883 = vmatmul.bf16.vlgmr.msra.gmra.mxu2 %v555_v63  ;;  %v3345_v59 = vld [vmem:[#allocation5 + $0x4d8] sm:$0xff]  ;;  %v3344_v63 = vld [vmem:[#allocation5 + $0x4d0] sm:$0xff] }
  0x79   :  { %1927 = vmatpush.bf16.msrb.mxu2 %v3309_v60  ;;  %1896 = vmatmul.bf16.vlgmr.msra.gmra.mxu3 %v556_v1  ;;  %v3320_v60 = vld [vmem:[#allocation5 + $0x410] sm:$0xff]  ;;  %v3327_v1 = vld [vmem:[#allocation5 + $0x448] sm:$0xff] }
  0x7a   :  { %1940 = vmatpush.bf16.msrb.mxu3 %v3317_v61  ;;  %v3328_v61 = vld [vmem:[#allocation5 + $0x450] sm:$0xff] }
  0x7b   :  { %1902 = vmatpush.bf16.msrb.mxu0 %v3292_v2  ;;  %v3335_v2 = vld [vmem:[#allocation5 + $0x488] sm:$0xff] }
  0x7c   :  { %1915 = vmatpush.bf16.msrb.mxu1 %v3300_v3  ;;  %v3343_v3 = vld [vmem:[#allocation5 + $0x4c8] sm:$0xff] }
  0x7d   :  { %1928 = vmatpush.bf16.msrb.mxu2 %v3308_v4  ;;  %v117_v4 = vld [vmem:[#allocation2 + $0x40] sm:$0xff] }
  0x7e   :  { %1941 = vmatpush.bf16.msrb.mxu3 %v3316_v5  ;;  %v118_v5 = vld [vmem:[#allocation2 + $0x48] sm:$0xff] }
  0x7f   :  { %1903 = vmatpush.bf16.msrb.mxu0 %v3291_v6  ;;  %v3318_v6 = vld [vmem:[#allocation5 + $0x400] sm:$0xff] }
  0x80   :  { %1916 = vmatpush.bf16.msrb.mxu1 %v3299_v7  ;;  %v3326_v7 = vld [vmem:[#allocation5 + $0x440] sm:$0xff] }
  0x81   :  { %1929 = vmatpush.bf16.msrb.mxu2 %v3307_v8  ;;  %v537_v8 = vunpack.c.l.b16 %v117_v4 }
  0x82   :  { %1942 = vmatpush.bf16.msrb.mxu3 %v3315_v9  ;;  %v539_v9 = vunpack.c.l.b16 %v118_v5 }
  0x83   :  { %1904 = vmatpush.bf16.msrb.mxu0 %v3290_v10  ;;  %v3334_v10 = vld [vmem:[#allocation5 + $0x480] sm:$0xff] }
  0x84   :  { %1917 = vmatpush.bf16.msrb.mxu1 %v3298_v11  ;;  %v3342_v11 = vld [vmem:[#allocation5 + $0x4c0] sm:$0xff] }
  0x85   :  { %1930 = vmatpush.bf16.msrb.mxu2 %v3306_v12  ;;  %v538_v12 = vunpack.c.h.b16 %v117_v4  ;;  %v3374_v4 = vld [vmem:[#allocation5 + $0x5c0] sm:$0xff] }
  0x86   :  { %1943 = vmatpush.bf16.msrb.mxu3 %v3314_v13  ;;  %v540_v13 = vunpack.c.h.b16 %v118_v5 }
  0x87   :  { %1905 = vmatpush.bf16.msrb.mxu0 %v3289_v14  ;;  %v3357_v14 = vld [vmem:[#allocation5 + $0x538] sm:$0xff] }
  0x88   :  { %1918 = vmatpush.bf16.msrb.mxu1 %v3297_v15  ;;  %v3365_v15 = vld [vmem:[#allocation5 + $0x578] sm:$0xff] }
  0x89   :  { %1931 = vmatpush.bf16.msrb.mxu2 %v3305_v16  ;;  %v3373_v16 = vld [vmem:[#allocation5 + $0x5b8] sm:$0xff] }
  0x8a   :  { %1944 = vmatpush.bf16.msrb.mxu3 %v3313_v17  ;;  %v3381_v17 = vld [vmem:[#allocation5 + $0x5f8] sm:$0xff] }
  0x8b   :  { %1906 = vmatpush.bf16.msrb.mxu0 %v3288_v18  ;;  %v561_v18 = vpack.c.b16 %v537_v8, %v537_v8 }
  0x8c   :  { %1919 = vmatpush.bf16.msrb.mxu1 %v3296_v19  ;;  %v563_v19 = vpack.c.b16 %v539_v9, %v539_v9 }
  0x8d   :  { %1932 = vmatpush.bf16.msrb.mxu2 %v3304_v20  ;;  %v562_v20 = vpack.c.b16 %v538_v12, %v538_v12 }
  0x8e   :  { %1945 = vmatpush.bf16.msrb.mxu3 %v3312_v21  ;;  %v564_v21 = vpack.c.b16 %v540_v13, %v540_v13 }
  0x8f   :  { %1907 = vmatpush.bf16.msrb.mxu0 %v3287_v22  ;;  %v3356_v22 = vld [vmem:[#allocation5 + $0x530] sm:$0xff] }
  0x90   :  { %1920 = vmatpush.bf16.msrb.mxu1 %v3295_v23  ;;  %v3364_v23 = vld [vmem:[#allocation5 + $0x570] sm:$0xff] }
  0x91   :  { %1933 = vmatpush.bf16.msrb.mxu2 %v3303_v24  ;;  %v3372_v24 = vld [vmem:[#allocation5 + $0x5b0] sm:$0xff] }
  0x92   :  { %1946 = vmatpush.bf16.msrb.mxu3 %v3311_v25  ;;  %v3380_v25 = vld [vmem:[#allocation5 + $0x5f0] sm:$0xff] }
  0x93   :  { %1908 = vmatpush.bf16.msrb.mxu0 %v3286_v28  ;;  %v3414_v28 = vld [vmem:[%s3660_s2] ss:$0 sm:$0xff] }
  0x94   :  { %1921 = vmatpush.bf16.msrb.mxu1 %v3294_v29  ;;  %v3371_v29 = vld [vmem:[#allocation5 + $0x5a8] sm:$0xff] }
  0x95   :  { %1934 = vmatpush.bf16.msrb.mxu2 %v3302_v32  ;;  %v3354_v32 = vld [vmem:[#allocation5 + $0x520] sm:$0xff] }
  0x96   :  { %1947 = vmatpush.bf16.msrb.mxu3 %v3310_v33  ;;  %1909 = vmatmul.bf16.vlgmr.msrb.gmra.mxu0 %v557_v40  ;;  %v3362_v33 = vld [vmem:[#allocation5 + $0x560] sm:$0xff]  ;;  %v3361_v40 = vld [vmem:[#allocation5 + $0x558] sm:$0xff] }
  0x97   :  { %1953 = vmatpush.bf16.msra.mxu0 %v3325_v36  ;;  %1922 = vmatmul.bf16.vlgmr.msrb.gmra.mxu1 %v558_v42  ;;  %v3370_v36 = vld [vmem:[#allocation5 + $0x5a0] sm:$0xff]  ;;  %v3377_v42 = vld [vmem:[#allocation5 + $0x5d8] sm:$0xff] }
  0x98   :  { %1966 = vmatpush.bf16.msra.mxu1 %v3333_v37  ;;  %1935 = vmatmul.bf16.vlgmr.msrb.gmra.mxu2 %v559_v41  ;;  %v3378_v37 = vld [vmem:[#allocation5 + $0x5e0] sm:$0xff]  ;;  %v3369_v41 = vld [vmem:[#allocation5 + $0x598] sm:$0xff] }
  0x99   :  { %1979 = vmatpush.bf16.msra.mxu2 %v3341_v38  ;;  %1948 = vmatmul.bf16.vlgmr.msrb.gmra.mxu3 %v560_v43 }
  0x9a   :  { %1992 = vmatpush.bf16.msra.mxu3 %v3349_v39  ;;  %v3353_v39 = vld [vmem:[#allocation5 + $0x518] sm:$0xff] }
  0x9b   :  { %1954 = vmatpush.bf16.msra.mxu0 %v3324_v44 }
  0x9c   :  { %1967 = vmatpush.bf16.msra.mxu1 %v3332_v45 }
  0x9d   :  { %1980 = vmatpush.bf16.msra.mxu2 %v3340_v46 }
  0x9e   :  { %1993 = vmatpush.bf16.msra.mxu3 %v3348_v47  ;;  %v3352_v47 = vld [vmem:[#allocation5 + $0x510] sm:$0xff] }
  0x9f   :  { %1955 = vmatpush.bf16.msra.mxu0 %v3323_v48  ;;  %v3360_v48 = vld [vmem:[#allocation5 + $0x550] sm:$0xff] }
  0xa0   :  { %1968 = vmatpush.bf16.msra.mxu1 %v3331_v49 }
  0xa1   :  { %1981 = vmatpush.bf16.msra.mxu2 %v3339_v50 }
  0xa2   :  { %1994 = vmatpush.bf16.msra.mxu3 %v3347_v51  ;;  %v3368_v51 = vld [vmem:[#allocation5 + $0x590] sm:$0xff] }
  0xa3   :  { %1956 = vmatpush.bf16.msra.mxu0 %v3322_v52  ;;  %v3376_v52 = vld [vmem:[#allocation5 + $0x5d0] sm:$0xff] }
  0xa4   :  { %1969 = vmatpush.bf16.msra.mxu1 %v3330_v53  ;;  %v3351_v53 = vld [vmem:[#allocation5 + $0x508] sm:$0xff] }
  0xa5   :  { %1982 = vmatpush.bf16.msra.mxu2 %v3338_v54  ;;  %v3359_v54 = vld [vmem:[#allocation5 + $0x548] sm:$0xff] }
  0xa6   :  { %1995 = vmatpush.bf16.msra.mxu3 %v3346_v55  ;;  %v119_v55 = vld [vmem:[#allocation2 + $0x50] sm:$0xff] }
  0xa7   :  { %1957 = vmatpush.bf16.msra.mxu0 %v3321_v56  ;;  %v3367_v56 = vld [vmem:[#allocation5 + $0x588] sm:$0xff] }
  0xa8   :  { %1970 = vmatpush.bf16.msra.mxu1 %v3329_v57  ;;  %v3375_v57 = vld [vmem:[#allocation5 + $0x5c8] sm:$0xff] }
  0xa9   :  { %1983 = vmatpush.bf16.msra.mxu2 %v3337_v58  ;;  %v120_v58 = vld [vmem:[#allocation2 + $0x58] sm:$0xff] }
  0xaa   :  { %1996 = vmatpush.bf16.msra.mxu3 %v3345_v59 }
  0xab   :  { %1958 = vmatpush.bf16.msra.mxu0 %v3320_v60 }
  0xac   :  { %1971 = vmatpush.bf16.msra.mxu1 %v3328_v61  ;;  %v541_v61 = vunpack.c.l.b16 %v119_v55 }
  0xad   :  { %1984 = vmatpush.bf16.msra.mxu2 %v3336_v62  ;;  %v542_v62 = vunpack.c.h.b16 %v119_v55 }
  0xae   :  { %1997 = vmatpush.bf16.msra.mxu3 %v3344_v63  ;;  %v3350_v63 = vld [vmem:[#allocation5 + $0x500] sm:$0xff]  ;;  %v565_v5 = vpack.c.b16 %v541_v61, %v541_v61  ;;  %v3396_v61 = vld [vmem:[#allocation8 + $0x30] sm:$0xff] }
  0xaf   :  { %1959 = vmatpush.bf16.msra.mxu0 %v3319_v0  ;;  %v3358_v0 = vld [vmem:[#allocation5 + $0x540] sm:$0xff] }
  0xb0   :  { %1972 = vmatpush.bf16.msra.mxu1 %v3327_v1  ;;  %v543_v1 = vunpack.c.l.b16 %v120_v58 }
  0xb1   :  { %1985 = vmatpush.bf16.msra.mxu2 %v3335_v2  ;;  %v544_v2 = vunpack.c.h.b16 %v120_v58  ;;  %v3397_v58 = vld [vmem:[#allocation8 + $0x38] sm:$0xff] }
  0xb2   :  { %1998 = vmatpush.bf16.msra.mxu3 %v3343_v3  ;;  %v3366_v3 = vld [vmem:[#allocation5 + $0x580] sm:$0xff] }
  0xb3   :  { %1960 = vmatpush.bf16.msra.mxu0 %v3318_v6  ;;  %v1754_v31 = vpop.f32.mrf.mxu0  ;;  %v566_v6 = vpack.c.b16 %v542_v62, %v542_v62  ;;  %v568_v8 = vpack.c.b16 %v544_v2, %v544_v2  ;;  %v3394_v2 = vld [vmem:[#allocation8 + $0x20] sm:$0xff] }
  0xb4   :  { %1973 = vmatpush.bf16.msra.mxu1 %v3326_v7  ;;  %v1755_v34 = vadd.f32 %v3414_v28, %v1754_v31  ;;  %v1767_v35 = vpop.f32.mrf.mxu1  ;;  %v567_v7 = vpack.c.b16 %v543_v1, %v543_v1 }
  0xb5   :  { %1986 = vmatpush.bf16.msra.mxu2 %v3334_v10 }
  0xb6   :  { %1999 = vmatpush.bf16.msra.mxu3 %v3342_v11  ;;  %1961 = vmatmul.bf16.vlgmr.msra.gmra.mxu0 %v561_v18  ;;  %v1768_v38 = vadd.f32 %v1767_v35, %v1755_v34 }
  0xb7   :  { %2005 = vmatpush.bf16.msrb.mxu0 %v3357_v14  ;;  %1974 = vmatmul.bf16.vlgmr.msra.gmra.mxu1 %v562_v20 }
  0xb8   :  { %2018 = vmatpush.bf16.msrb.mxu1 %v3365_v15  ;;  %1987 = vmatmul.bf16.vlgmr.msra.gmra.mxu2 %v563_v19 }
  0xb9   :  { %2031 = vmatpush.bf16.msrb.mxu2 %v3373_v16  ;;  %2000 = vmatmul.bf16.vlgmr.msra.gmra.mxu3 %v564_v21 }
  0xba   :  { %2044 = vmatpush.bf16.msrb.mxu3 %v3381_v17 }
  0xbb   :  { %2006 = vmatpush.bf16.msrb.mxu0 %v3356_v22  ;;  %v1780_v43 = vpop.f32.mrf.mxu2  ;;  %v1756_v46 = vpop.f32.mrf.mxu0 }
  0xbc   :  { %2019 = vmatpush.bf16.msrb.mxu1 %v3364_v23  ;;  %v1781_v44 = vadd.f32 %v1780_v43, %v1768_v38  ;;  %v1793_v45 = vpop.f32.mrf.mxu3  ;;  %v1769_v50 = vpop.f32.mrf.mxu1 }
  0xbd   :  { %2032 = vmatpush.bf16.msrb.mxu2 %v3372_v24 }
  0xbe   :  { %2045 = vmatpush.bf16.msrb.mxu3 %v3380_v25  ;;  %v1794_v49 = vadd.f32 %v1793_v45, %v1781_v44  ;;  %v3386_v44 = vld [vmem:[#allocation7 + $0x20] sm:$0xff]  ;;  %v3385_v45 = vld [vmem:[#allocation7 + $0x18] sm:$0xff] }
  0xbf   :  { %2007 = vmatpush.bf16.msrb.mxu0 %v3355_v26 }
  0xc0   :  { %2020 = vmatpush.bf16.msrb.mxu1 %v3363_v27 }
  0xc1   :  { %2033 = vmatpush.bf16.msrb.mxu2 %v3371_v29 }
  0xc2   :  { %2046 = vmatpush.bf16.msrb.mxu3 %v3379_v30 }
  0xc3   :  { %2008 = vmatpush.bf16.msrb.mxu0 %v3354_v32  ;;  %v1782_v59 = vpop.f32.mrf.mxu2 }
  0xc4   :  { %2021 = vmatpush.bf16.msrb.mxu1 %v3362_v33  ;;  %v1795_v60 = vpop.f32.mrf.mxu3 }
  0xc5   :  { %2034 = vmatpush.bf16.msrb.mxu2 %v3370_v36 }
  0xc6   :  { %2047 = vmatpush.bf16.msrb.mxu3 %v3378_v37  ;;  %v3389_v37 = vld [vmem:[#allocation7 + $0x38] sm:$0xff] }
  0xc7   :  { %2009 = vmatpush.bf16.msrb.mxu0 %v3353_v39 }
  0xc8   :  { %2022 = vmatpush.bf16.msrb.mxu1 %v3361_v40  ;;  %v3388_v40 = vld [vmem:[#allocation7 + $0x30] sm:$0xff] }
  0xc9   :  { %2035 = vmatpush.bf16.msrb.mxu2 %v3369_v41  ;;  %v3387_v41 = vld [vmem:[#allocation7 + $0x28] sm:$0xff] }
  0xca   :  { %2048 = vmatpush.bf16.msrb.mxu3 %v3377_v42 }
  0xcb   :  { %2010 = vmatpush.bf16.msrb.mxu0 %v3352_v47  ;;  %v3384_v47 = vld [vmem:[#allocation7 + $0x10] sm:$0xff] }
  0xcc   :  { %2023 = vmatpush.bf16.msrb.mxu1 %v3360_v48 }
  0xcd   :  { %2036 = vmatpush.bf16.msrb.mxu2 %v3368_v51 }
  0xce   :  { %2049 = vmatpush.bf16.msrb.mxu3 %v3376_v52 }
  0xcf   :  { %2011 = vmatpush.bf16.msrb.mxu0 %v3351_v53 }
  0xd0   :  { %2024 = vmatpush.bf16.msrb.mxu1 %v3359_v54  ;;  %v3382_v54 = vld [vmem:[#allocation7] sm:$0xff] }
  0xd1   :  { %2037 = vmatpush.bf16.msrb.mxu2 %v3367_v56 }
  0xd2   :  { %2050 = vmatpush.bf16.msrb.mxu3 %v3375_v57 }
  0xd3   :  { %2012 = vmatpush.bf16.msrb.mxu0 %v3350_v63  ;;  %v1806_v9 = vpop.f32.mrf.mxu0 }
  0xd4   :  { %2025 = vmatpush.bf16.msrb.mxu1 %v3358_v0  ;;  %v1807_v10 = vadd.f32 %v1806_v9, %v1794_v49  ;;  %v1819_v11 = vpop.f32.mrf.mxu1  ;;  %v3383_v49 = vld [vmem:[#allocation7 + $0x8] sm:$0xff]  ;;  %v3392_v9 = vld [vmem:[#allocation8 + $0x10] sm:$0xff] }
  0xd5   :  { %2038 = vmatpush.bf16.msrb.mxu2 %v3366_v3  ;;  %v3395_v0 = vld [vmem:[#allocation8 + $0x28] sm:$0xff] }
  0xd6   :  { %2051 = vmatpush.bf16.msrb.mxu3 %v3374_v4  ;;  %2013 = vmatmul.bf16.vlgmr.msrb.gmra.mxu0 %v565_v5  ;;  %v1820_v12 = vadd.f32 %v1819_v11, %v1807_v10  ;;  %v3393_v4 = vld [vmem:[#allocation8 + $0x18] sm:$0xff] }
  0xd7   :  { %2026 = vmatmul.bf16.vlgmr.msrb.gmra.mxu1 %v566_v6  ;;  %2127 = vmatpush.bf16.msra.mxu0 %v3389_v37  ;;  %v3416_v37 = vld [vmem:[%s3664_s6] ss:$0 sm:$0xff] }
  0xd8   :  { %2039 = vmatmul.bf16.vlgmr.msrb.gmra.mxu2 %v567_v7  ;;  %2210 = vmatpush.bf16.msra.mxu1 %v3397_v58 }
  0xd9   :  { %2052 = vmatmul.bf16.vlgmr.msrb.gmra.mxu3 %v568_v8 }
  0xdb   :  { %v1832_v13 = vpop.f32.mrf.mxu2  ;;  %v1808_v16 = vpop.f32.mrf.mxu0  ;;  %2128 = vmatpush.bf16.msra.mxu0 %v3388_v40 }
  0xdc   :  { %v1833_v14 = vadd.f32 %v1832_v13, %v1820_v12  ;;  %v1845_v15 = vpop.f32.mrf.mxu3  ;;  %v1821_v18 = vpop.f32.mrf.mxu1  ;;  %2211 = vmatpush.bf16.msra.mxu1 %v3396_v61 }
  0xde   :  { %v1846_v17 = vadd.f32 %v1845_v15, %v1833_v14 }
  0xdf   :  { %2129 = vmatpush.bf16.msra.mxu0 %v3387_v41 }
  0xe0   :  { %2212 = vmatpush.bf16.msra.mxu1 %v3395_v0 }
  0xe3   :  { %v1834_v19 = vpop.f32.mrf.mxu2  ;;  %2130 = vmatpush.bf16.msra.mxu0 %v3386_v44 }
  0xe4   :  { %v1847_v20 = vpop.f32.mrf.mxu3  ;;  %2213 = vmatpush.bf16.msra.mxu1 %v3394_v2 }
  0xe7   :  { %2131 = vmatpush.bf16.msra.mxu0 %v3385_v45 }
  0xe8   :  { %2214 = vmatpush.bf16.msra.mxu1 %v3393_v4 }
  0xeb   :  { %2132 = vmatpush.bf16.msra.mxu0 %v3384_v47 }
  0xec   :  { %2215 = vmatpush.bf16.msra.mxu1 %v3392_v9 }
  0xef   :  { %2133 = vmatpush.bf16.msra.mxu0 %v3383_v49 }
  0xf3   :  { %v1858_v21 = vpop.f32.mrf.mxu0  ;;  %2134 = vmatpush.bf16.msra.mxu0 %v3382_v54 }
  0xf4   :  { %v1859_v22 = vadd.f32 %v1858_v21, %v1846_v17  ;;  %v1871_v23 = vpop.f32.mrf.mxu1  ;;  %v3391_v21 = vld [vmem:[#allocation8 + $0x8] sm:$0xff] }
  0xf5   :  { %2216 = vmatpush.bf16.msra.mxu1 %v3391_v21 }
  0xf6   :  { %v1872_v24 = vadd.f32 %v1871_v23, %v1859_v22  ;;  %v3390_v22 = vld [vmem:[#allocation8] sm:$0xff]  ;;  %v3405_v23 = vld [vmem:[#allocation10 + $0x38] sm:$0xff] }
  0xf7   :  { %2293 = vmatpush.bf16.msra.mxu2 %v3405_v23 }
  0xf9   :  { %2217 = vmatpush.bf16.msra.mxu1 %v3390_v22 }
  0xfb   :  { %v1884_v25 = vpop.f32.mrf.mxu2  ;;  %v1860_v28 = vpop.f32.mrf.mxu0 }
  0xfc   :  { %v1885_v26 = vadd.f32 %v1884_v25, %v1872_v24  ;;  %v1897_v27 = vpop.f32.mrf.mxu3  ;;  %v1873_v30 = vpop.f32.mrf.mxu1  ;;  %v3404_v24 = vld [vmem:[#allocation10 + $0x30] sm:$0xff]  ;;  %v3403_v25 = vld [vmem:[#allocation10 + $0x28] sm:$0xff] }
  0xfd   :  { %2294 = vmatpush.bf16.msra.mxu2 %v3404_v24  ;;  %v3400_v28 = vld [vmem:[#allocation10 + $0x10] sm:$0xff] }
  0xfe   :  { %v1898_v29 = vadd.f32 %v1897_v27, %v1885_v26  ;;  %v3402_v26 = vld [vmem:[#allocation10 + $0x20] sm:$0xff]  ;;  %v3401_v27 = vld [vmem:[#allocation10 + $0x18] sm:$0xff] }
 0x101   :  { %2295 = vmatpush.bf16.msra.mxu2 %v3403_v25 }
 0x103   :  { %v1886_v31 = vpop.f32.mrf.mxu2 }
 0x104   :  { %v1899_v32 = vpop.f32.mrf.mxu3 }
 0x105   :  { %2296 = vmatpush.bf16.msra.mxu2 %v3402_v26 }
 0x109   :  { %2297 = vmatpush.bf16.msra.mxu2 %v3401_v27 }
 0x10d   :  { %2298 = vmatpush.bf16.msra.mxu2 %v3400_v28 }
 0x113   :  { %v1910_v33 = vpop.f32.mrf.mxu0 }
 0x114   :  { %v1923_v34 = vpop.f32.mrf.mxu1  ;;  %v1911_v51 = vadd.f32 %v1910_v33, %v1898_v29  ;;  %v3415_v29 = vld [vmem:[%s3662_s4] ss:$0 sm:$0xff] }
 0x116   :  { %v1924_v56 = vadd.f32 %v1923_v34, %v1911_v51 }
 0x11b   :  { %v1936_v35 = vpop.f32.mrf.mxu2  ;;  %v1912_v38 = vpop.f32.mrf.mxu0 }
 0x11c   :  { %v1949_v36 = vpop.f32.mrf.mxu3  ;;  %v1925_v39 = vpop.f32.mrf.mxu1  ;;  %v1937_v57 = vadd.f32 %v1936_v35, %v1924_v56  ;;  %v3399_v35 = vld [vmem:[#allocation10 + $0x8] sm:$0xff] }
 0x11d   :  { %2299 = vmatpush.bf16.msra.mxu2 %v3399_v35 }
 0x11e   :  { %v1950_v62 = vadd.f32 %v1949_v36, %v1937_v57  ;;  %v3398_v36 = vld [vmem:[#allocation10] sm:$0xff] }
 0x121   :  { %2300 = vmatpush.bf16.msra.mxu2 %v3398_v36 }
 0x123   :  { %v1938_v42 = vpop.f32.mrf.mxu2 }
 0x124   :  { %v1951_v43 = vpop.f32.mrf.mxu3 }
 0x125   :  { %v3417_v43 = vld [vmem:[%s3666_s8] ss:$0 sm:$0xff] }
 0x133   :  { %v1962_v46 = vpop.f32.mrf.mxu0 }
 0x134   :  { %v1975_v48 = vpop.f32.mrf.mxu1  ;;  %v1963_v63 = vadd.f32 %v1962_v46, %v1950_v62 }
 0x136   :  { %v1976_v1 = vadd.f32 %v1975_v48, %v1963_v63 }
 0x13b   :  { %v1988_v50 = vpop.f32.mrf.mxu2  ;;  %v1964_v53 = vpop.f32.mrf.mxu0 }
 0x13c   :  { %v2001_v52 = vpop.f32.mrf.mxu3  ;;  %v1977_v55 = vpop.f32.mrf.mxu1  ;;  %v1989_v3 = vadd.f32 %v1988_v50, %v1976_v1 }
 0x13e   :  { %v2002_v5 = vadd.f32 %v2001_v52, %v1989_v3 }
 0x143   :  { %v1990_v59 = vpop.f32.mrf.mxu2 }
 0x144   :  { %v2003_v60 = vpop.f32.mrf.mxu3 }
 0x153   :  { %v2014_v6 = vpop.f32.mrf.mxu0 }
 0x154   :  { %v2027_v7 = vpop.f32.mrf.mxu1  ;;  %v2015_v8 = vadd.f32 %v2014_v6, %v2002_v5 }
 0x156   :  { %v2028_v10 = vadd.f32 %v2027_v7, %v2015_v8 }
 0x15b   :  { %v2040_v11 = vpop.f32.mrf.mxu2  ;;  %v2016_v14 = vpop.f32.mrf.mxu0 }
 0x15c   :  { %v2053_v12 = vpop.f32.mrf.mxu3  ;;  %v2041_v13 = vadd.f32 %v2040_v11, %v2028_v10  ;;  %v2029_v15 = vpop.f32.mrf.mxu1 }
 0x15e   :  { %v2054_v16 = vadd.f32 %v2053_v12, %v2041_v13 }
 0x160   :  { %v2057_v17 = vmax.f32 %v2054_v16, 0.0 }
 0x162   :  { %v2058_v18 = vpack.c.bf16 %v2057_v17, %v2057_v17 }
 0x163   :  { %v2042_v19 = vpop.f32.mrf.mxu2 }
 0x164   :  { %v2055_v20 = vpop.f32.mrf.mxu3  ;;  %2135 = vmatmul.bf16.vlgmr.msra.gmra.mxu0 %v2058_v18 }
 0x1e1   :  { %v2136_v30 = vpop.f32.mrf.mxu0 }
 0x1e2   :  { %v2137_v31 = vadd.f32 %v3415_v29, %v2136_v30 }
 0x1e4   :  { %v2140_v32 = vmax.f32 %v2137_v31, 0.0 }
 0x1e6   :  { %v2141_v33 = vpack.c.bf16 %v2140_v32, %v2140_v32 }
 0x1e8   :  { %2218 = vmatmul.bf16.vlgmr.msra.gmra.mxu1 %v2141_v33 }
 0x1e9   :  { %v2138_v34 = vpop.f32.mrf.mxu0 }
 0x265   :  { %v2219_v38 = vpop.f32.mrf.mxu1 }
 0x266   :  { %v2220_v39 = vadd.f32 %v3416_v37, %v2219_v38 }
 0x268   :  { %v2223_v40 = vmax.f32 %v2220_v39, 0.0 }
 0x26a   :  { %v2224_v41 = vpack.c.bf16 %v2223_v40, %v2223_v40 }
 0x26c   :  { %2301 = vmatmul.bf16.vlgmr.msra.gmra.mxu2 %v2224_v41 }
 0x26d   :  { %v2221_v42 = vpop.f32.mrf.mxu1 }
 0x2ef   :  { %v2302_v44 = vpop.f32.mrf.mxu2 }
 0x2f0   :  { %v2303_v45 = vadd.f32 %v3417_v43, %v2302_v44 }
 0x2f2   :  { %2306 = vst [vmem:[#allocation11] sm:$0xff] %v2303_v45 }
 0x2f3   :  { %2317 = dma.vmem_to_hbm [thread:$0]  %s2313_s17, 128, %s2315_s20, [#allocation4]  }
 0x2f7   :  { %v2304_v46 = vpop.f32.mrf.mxu2 }
 0x2f8   :  { %3568 = dma.done.wait [#allocation4], 128  }
 0x2f9   :  { %3569 = vsyncadd [#allocation4], 4294967168 }
 0x2fa   :  { %2322 = vsyncpa [#allocation3], 1 }
 0x2fb   :  { %2323 = vsyncpa [#allocation6], 1 }
 0x2fc   :  { %2324 = vsyncpa [#allocation9], 1 }
 0x2fd   :  { %2325 = vsyncpa [#allocation4], 1 }

</bundles_post_ra>
